<compile_context>
chip_gen: v5e
topology: v5e:2x2
jax: 0.10.0
libtpu: 0.0.40
codegen_flags: <defaults>
</compile_context>

<pallas_src>
import numpy as np
import jax
import jax.numpy as jnp
from jax import lax
from jax.experimental import pallas as pl
from jax.experimental.pallas import tpu as pltpu


def _attention_kernel(sqrt_k, b_blk, seq_len, dims, k_size, v_size):
    minus = -100.0

    def kernel(x_ref, wkv_ref, bkv_ref, out_ref):
        # x_ref: (Bb, T, D) block of batch rows (feature dim on the 128-lane axis).
        x = x_ref[...]                                            # (Bb, T, D)

        # Fused key/value projection as one MXU matmul with M = Bb*T.
        x2 = x.reshape(b_blk * seq_len, dims)                     # (Bb*T, D)
        kv = jnp.dot(x2, wkv_ref[...],
                     preferred_element_type=jnp.float32) + bkv_ref[...]  # (Bb*T, K+V)
        keys = kv[:, :k_size].reshape(b_blk, seq_len, k_size)     # (Bb, T, K)
        vals = kv[:, k_size:].reshape(b_blk, seq_len, v_size)     # (Bb, T, V)

        # queries == keys (matches the PyTorch forward).
        # Batched K K^T without materializing a transposed copy of keys.
        logits = lax.dot_general(
            keys, keys,
            dimension_numbers=(((2,), (2,)), ((0,), (0,))),
            preferred_element_type=jnp.float32) / sqrt_k          # (Bb, T, T)

        # Causal mask generated in-kernel; masked positions get exactly -100.0,
        # identical to mask*logits + (-100)*(1 - mask) with the module's tril mask.
        row = lax.broadcasted_iota(jnp.int32, (seq_len, seq_len), 0)
        col = lax.broadcasted_iota(jnp.int32, (seq_len, seq_len), 1)
        logits = jnp.where(row >= col, logits, minus)

        # Numerically stable softmax over the last axis (f32, exact).
        m = jnp.max(logits, axis=-1, keepdims=True)
        e = jnp.exp(logits - m)
        probs = e * pl.reciprocal(jnp.sum(e, axis=-1, keepdims=True),
                                  approx=False)

        # read = probs @ values (batched).
        read = lax.dot_general(
            probs, vals,
            dimension_numbers=(((2,), (1,)), ((0,), (0,))),
            preferred_element_type=jnp.float32)                   # (Bb, T, V)

        # Fused concat: single store of the (Bb, T, D+V) output block.
        out_ref[...] = jnp.concatenate(
            [x, read.astype(x.dtype)], axis=-1).astype(out_ref.dtype)

    return kernel


def _vmem_limit_bytes():
    """Per-generation VMEM limit (explicit so scoped defaults don't cap tiling)."""
    try:
        info = pltpu.get_tpu_info()
        cap = getattr(info, "vmem_capacity_bytes", None)
        if not cap:
            cap = 64 << 20          # conservative (v7x physical) fallback
    except Exception:
        cap = 64 << 20
    # Half of physical VMEM: 64 MiB on v5e/v6e, 32 MiB on v7x.
    return int(min(cap // 2, 64 << 20))


def _pick_b_blk(B, T, D, K, V, vmem_budget_bytes, min_grid_steps):
    """Largest divisor of B whose per-step working set fits the VMEM budget and
    keeps at least `min_grid_steps` grid steps."""
    f32 = 4

    def step_bytes(bb):
        x_blk = 2 * bb * T * D * f32               # double-buffered input block
        out_blk = 2 * bb * T * (D + V) * f32       # double-buffered output block
        w = 2 * (D * (K + V) + (K + V)) * f32      # fused weights + bias (dbl-buf)
        kv = bb * T * (K + V) * f32                # projection result
        attn = 2 * bb * T * T * f32                # logits + probs
        rd = bb * T * V * f32                      # read
        return x_blk + out_blk + w + kv + attn + rd

    best = 1
    for bb in range(1, B + 1):
        if B % bb:
            continue
        if B >= min_grid_steps and (B // bb) < min_grid_steps:
            continue
        if step_bytes(bb) <= vmem_budget_bytes:
            best = bb
    return best


def attention_block(x, w_kv, b_kv, k_size, current_seq_len, b_blk=None):
    """x: (B, T, dims) f32; w_kv: (dims, k_size+v_size); b_kv: (1, k_size+v_size).
    Returns (B, T, dims + v_size)."""
    B, T, D = x.shape
    KV = w_kv.shape[1]
    K = k_size
    V = KV - K
    # The PyTorch forward requires the mask slice to broadcast against (B, T, T),
    # which implies current_seq_len == T for the provided minibatch.
    assert current_seq_len == T, "kernel processes the full provided sequence"
    sqrt_k = float(np.sqrt(K))

    vmem_limit = _vmem_limit_bytes()

    # Keep >= 2 grid steps when B >= 2 so v7x's two TensorCores both get work
    # (the "parallel" axis is sharded across cores); neutral on v5e/v6e.
    min_grid_steps = 2 if B >= 2 else 1
    if b_blk is None:
        b_blk = _pick_b_blk(B, T, D, K, V, vmem_limit // 2, min_grid_steps)
    assert B % b_blk == 0

    kernel = _attention_kernel(sqrt_k, b_blk, T, D, K, V)

    out = pl.pallas_call(
        kernel,
        out_shape=jax.ShapeDtypeStruct((B, T, D + V), jnp.float32),
        grid_spec=pltpu.PrefetchScalarGridSpec(
            num_scalar_prefetch=0,
            grid=(B // b_blk,),
            in_specs=[
                pl.BlockSpec((b_blk, T, D), lambda b: (b, 0, 0)),   # x block
                pl.BlockSpec((D, KV), lambda b: (0, 0)),            # fused W_kv
                pl.BlockSpec((1, KV), lambda b: (0, 0)),            # fused b_kv
            ],
            out_specs=pl.BlockSpec((b_blk, T, D + V), lambda b: (b, 0, 0)),
        ),
        compiler_params=pltpu.CompilerParams(
            dimension_semantics=("parallel",),
            vmem_limit_bytes=vmem_limit),
    )(x, w_kv, b_kv)

    return out


def reference_attention_block(x, w_key, b_key, w_val, b_val, mask, current_seq_len):
    """Pure-JAX reference mirroring the PyTorch forward."""
    K = w_key.shape[1]
    keys = x @ w_key + b_key            # (B, T, K)
    vals = x @ w_val + b_val            # (B, T, V)
    cur_mask = mask[:current_seq_len, :current_seq_len]
    logits = jnp.einsum("btk,bsk->bts", keys, keys) / jnp.sqrt(jnp.float32(K))
    logits = cur_mask * logits + (-100.0) * (1.0 - cur_mask)
    probs = jax.nn.softmax(logits, axis=2)
    read = jnp.einsum("bts,bsv->btv", probs, vals)
    return jnp.concatenate([x, read], axis=2)


if __name__ == "__main__":
    # Module hyperparameters: AttentionBlock(dims, k_size, v_size, seq_len)
    B, T = 2, 8
    dims, k_size, v_size, seq_len = 32, 16, 16, 8

    key = jax.random.PRNGKey(0)
    k_x, k_wk, k_bk, k_wv, k_bv = jax.random.split(key, 5)

    # Deterministic parameter init (Linear(dims, k_size) / Linear(dims, v_size)),
    # stored as (in_features, out_features) for x @ W + b.
    bound = 1.0 / np.sqrt(dims)
    w_key_p = jax.random.uniform(k_wk, (dims, k_size), jnp.float32, -bound, bound)
    b_key_p = jax.random.uniform(k_bk, (1, k_size), jnp.float32, -bound, bound)
    w_val_p = jax.random.uniform(k_wv, (dims, v_size), jnp.float32, -bound, bound)
    b_val_p = jax.random.uniform(k_bv, (1, v_size), jnp.float32, -bound, bound)

    # Non-trainable causal mask buffer: tril of ones (seq_len, seq_len).
    # It is regenerated in-kernel via iota, so only the reference consumes it.
    mask = jnp.tril(jnp.ones((seq_len, seq_len), dtype=jnp.float32))

    # Fuse K/V projection weights ONCE at setup time (outside the per-call path).
    w_kv = jnp.concatenate([w_key_p, w_val_p], axis=1)   # (D, K+V)
    b_kv = jnp.concatenate([b_key_p, b_val_p], axis=1)   # (1, K+V)

    x = jax.random.normal(k_x, (B, T, dims), dtype=jnp.float32)

    out = attention_block(x, w_kv, b_kv, k_size, current_seq_len=T)
    out = jax.block_until_ready(out)

    ref = reference_attention_block(x, w_key_p, b_key_p, w_val_p, b_val_p, mask,
                                    current_seq_len=T)
    np.testing.assert_allclose(np.asarray(out), np.asarray(ref),
                               rtol=1e-5, atol=1e-5)
    assert out.shape == (B, T, dims + v_size)

    print("KERNEL_OK")
</pallas_src>

<mosaic_0001>
module attributes {stable_mosaic.version = 11 : i64} {
  func.func @kernel(%arg0: i32, %arg1: memref<1x8x32xf32, #tpu.memory_space<vmem>>, %arg2: memref<32x32xf32, #tpu.memory_space<vmem>>, %arg3: memref<1x32xf32, #tpu.memory_space<vmem>>, %arg4: memref<1x8x48xf32, #tpu.memory_space<vmem>>) attributes {dimension_semantics = [#tpu.dimension_semantics<parallel>], iteration_bounds = array<i64: 2>, scalar_prefetch = 0 : i64, scratch_operands = 0 : i64, tpu.core_type = #tpu.core_type<tc>, window_params = [{transform_indices = @transform_0, window_bounds = array<i64: 1, 8, 32>}, {pipeline_mode = #tpu.pipeline_mode<synchronous>, transform_indices = @transform_1, window_bounds = array<i64: 32, 32>}, {pipeline_mode = #tpu.pipeline_mode<synchronous>, transform_indices = @transform_2, window_bounds = array<i64: 1, 32>}, {transform_indices = @transform_3, window_bounds = array<i64: 1, 8, 48>}]} {
    %c0 = arith.constant 0 : index
    %c0_0 = arith.constant 0 : index
    %c0_1 = arith.constant 0 : index
    %0 = vector.load %arg1[%c0, %c0_0, %c0_1] : memref<1x8x32xf32, #tpu.memory_space<vmem>>, vector<1x8x32xf32>
    %1 = vector.shape_cast %0 : vector<1x8x32xf32> to vector<8x32xf32>
    %c0_2 = arith.constant 0 : index
    %c0_3 = arith.constant 0 : index
    %2 = vector.load %arg2[%c0_2, %c0_3] : memref<32x32xf32, #tpu.memory_space<vmem>>, vector<32x32xf32>
    %cst = arith.constant dense<0.000000e+00> : vector<8x32xf32>
    %3 = tpu.matmul %1, %2, %cst {dimension_numbers = #tpu.dot_dimension_numbers<[1], [0], [0], [1], [0, 0, 1, 1], [], []>} : vector<8x32xf32>, vector<32x32xf32>, vector<8x32xf32> -> vector<8x32xf32>
    %c0_4 = arith.constant 0 : index
    %c0_5 = arith.constant 0 : index
    %4 = vector.load %arg3[%c0_4, %c0_5] : memref<1x32xf32, #tpu.memory_space<vmem>>, vector<1x32xf32>
    %5 = vector.broadcast %4 : vector<1x32xf32> to vector<8x32xf32>
    %6 = arith.addf %3, %5 : vector<8x32xf32>
    %7 = vector.extract_strided_slice %6 {offsets = [0, 0], sizes = [8, 16], strides = [1, 1]} : vector<8x32xf32> to vector<8x16xf32>
    %8 = vector.shape_cast %7 : vector<8x16xf32> to vector<1x8x16xf32>
    %9 = vector.extract_strided_slice %6 {offsets = [0, 16], sizes = [8, 16], strides = [1, 1]} : vector<8x32xf32> to vector<8x16xf32>
    %10 = vector.shape_cast %9 : vector<8x16xf32> to vector<1x8x16xf32>
    %cst_6 = arith.constant dense<0.000000e+00> : vector<1x8x8xf32>
    %11 = tpu.matmul %8, %8, %cst_6 {dimension_numbers = #tpu.dot_dimension_numbers<[2], [2], [1], [1], [0, 0, 0, 1, 1, 1], [0], [0]>} : vector<1x8x16xf32>, vector<1x8x16xf32>, vector<1x8x8xf32> -> vector<1x8x8xf32>
    %cst_7 = arith.constant 4.000000e+00 : f32
    %12 = vector.broadcast %cst_7 : f32 to vector<1x8x8xf32>
    %13 = arith.divf %11, %12 : vector<1x8x8xf32>
    %14 = tpu.iota {dimensions = array<i32: 0>} : vector<8x8xi32>
    %15 = tpu.iota {dimensions = array<i32: 1>} : vector<8x8xi32>
    %16 = arith.cmpi sge, %14, %15 : vector<8x8xi32>
    %cst_8 = arith.constant -1.000000e+02 : f32
    %17 = vector.shape_cast %16 : vector<8x8xi1> to vector<1x8x8xi1>
    %18 = vector.broadcast %cst_8 : f32 to vector<1x8x8xf32>
    %19 = arith.select %17, %13, %18 : vector<1x8x8xi1>, vector<1x8x8xf32>
    %cst_9 = arith.constant dense<0xFF800000> : vector<1x8xf32>
    %20 = vector.multi_reduction <maximumf>, %19, %cst_9 [2] : vector<1x8x8xf32> to vector<1x8xf32>
    %21 = vector.shape_cast %20 : vector<1x8xf32> to vector<1x8x1xf32>
    %22 = vector.broadcast %21 : vector<1x8x1xf32> to vector<1x8x8xf32>
    %23 = arith.subf %19, %22 : vector<1x8x8xf32>
    %24 = math.exp %23 : vector<1x8x8xf32>
    %cst_10 = arith.constant dense<0.000000e+00> : vector<1x8xf32>
    %25 = vector.multi_reduction <add>, %24, %cst_10 [2] : vector<1x8x8xf32> to vector<1x8xf32>
    %26 = vector.shape_cast %25 : vector<1x8xf32> to vector<1x8x1xf32>
    %27 = tpu.reciprocal %26 : vector<1x8x1xf32> -> vector<1x8x1xf32>
    %28 = vector.broadcast %27 : vector<1x8x1xf32> to vector<1x8x8xf32>
    %29 = arith.mulf %24, %28 : vector<1x8x8xf32>
    %cst_11 = arith.constant dense<0.000000e+00> : vector<1x8x16xf32>
    %30 = tpu.matmul %29, %10, %cst_11 {dimension_numbers = #tpu.dot_dimension_numbers<[2], [1], [1], [2], [0, 0, 0, 1, 1, 2], [0], [0]>} : vector<1x8x8xf32>, vector<1x8x16xf32>, vector<1x8x16xf32> -> vector<1x8x16xf32>
    %31 = tpu.concatenate %0, %30 in 2 : vector<1x8x32xf32>, vector<1x8x16xf32> -> vector<1x8x48xf32>
    %c0_12 = arith.constant 0 : index
    %c0_13 = arith.constant 0 : index
    %c0_14 = arith.constant 0 : index
    %32 = vector.load %arg4[%c0_12, %c0_13, %c0_14] : memref<1x8x48xf32, #tpu.memory_space<vmem>>, vector<1x8x48xf32>
    tpu.vector_store %arg4[%c0_12, %c0_13, %c0_14], %31 {strides = array<i32>} : memref<1x8x48xf32, #tpu.memory_space<vmem>>, vector<1x8x48xf32>,
    return
  }
  func.func @transform_0(%arg0: i32) -> (i32, i32, i32) {
    %c0_i32 = arith.constant 0 : i32
    %c0_i32_0 = arith.constant 0 : i32
    %c0_i32_1 = arith.constant 0 : i32
    return %arg0, %c0_i32, %c0_i32_0 : i32, i32, i32
  }
  func.func @transform_1(%arg0: i32) -> (i32, i32) {
    %c0_i32 = arith.constant 0 : i32
    %c0_i32_0 = arith.constant 0 : i32
    %c0_i32_1 = arith.constant 0 : i32
    return %c0_i32, %c0_i32_0 : i32, i32
  }
  func.func @transform_2(%arg0: i32) -> (i32, i32) {
    %c0_i32 = arith.constant 0 : i32
    %c0_i32_0 = arith.constant 0 : i32
    %c0_i32_1 = arith.constant 0 : i32
    return %c0_i32, %c0_i32_0 : i32, i32
  }
  func.func @transform_3(%arg0: i32) -> (i32, i32, i32) {
    %c0_i32 = arith.constant 0 : i32
    %c0_i32_0 = arith.constant 0 : i32
    %c0_i32_1 = arith.constant 0 : i32
    return %arg0, %c0_i32, %c0_i32_0 : i32, i32, i32
  }
}

</mosaic_0001>

<bundles_post_ra>
// kernel: tpu_custom_call.1
= control target key start
LH: loop header
LB: loop body
LE: loop exit
PB: predicated region body
PF: predicated region fallthrough
CT: control target
= control target key end

     0   :  { %8 = vsyncpa [#allocation3], 0  ;;  %s827_s0 = inlined_call_operand.hbm [shape: f32[2,8,32], index: 0, kind: input, shape index: {}]   ;;  %s828_s1 = inlined_call_operand.hbm [shape: f32[32,32], index: 1, kind: input, shape index: {}]   ;;  %s829_s2 = inlined_call_operand.vmem [shape: f32[1,32], index: 2, kind: input, shape index: {}]   ;;  %s830_s3 = inlined_call_operand.hbm [shape: f32[2,8,48], index: 3, kind: output, shape index: {}]  }
   0x1   :  { %10 = vsyncpa [#allocation3 + $0x1], 0 }
   0x2   :  { %11 = vsyncpa [#allocation6], 0 }
   0x3   :  { %12 = vsyncpa [#allocation4], 0 }
   0x4   :  { %14 = vsyncpa [#allocation4 + $0x1], 0  ;;  %s675_s12 = smov 0   ;;  %s677_s13 = smov 0  }
   0x5   :  { %s679_s14 = smov 0   ;;  %s681_s15 = smov 0  }
   0x6 LB: > { %s130_s18 = sshll.u32 %s828_s1, 4  ;;  %s699_s19 = sadd.s32 4294967295, %s647_s15   ;;  %s647_s15 = sphi %s681_s15, %s840_s15   ;;  %s643_s14 = sphi %s679_s14, %s839_s14   ;;  %s639_s13 = sphi %s677_s13, %s838_s13   ;;  %s635_s12 = sphi %s675_s12, %s837_s12   ;;  %s131_s18 = int_to_ptr.hbm [resolvable:$true] %s130_s18 }
   0x7   : > { %p431_p0 = scmp.ge.s32.totalorder %s647_s15, 1  ;;  %p41_p1 = scmp.eq.s32.totalorder %s699_s19, 0 }
   0x8   : > { %p119_p2 = scmp.lt.s32.totalorder %s647_s15, 3  ;;  %s649_s21 = smov [#allocation5]  }
   0x9   : > { %s132_s22 = sshll.u32 %s649_s21, 4  ;;  %s650_s23 = smov 128   ;;  %s133_s22 = int_to_ptr.vmem [resolvable:$true] %s132_s22 }
   0xa   : > { %p704_p3 = pnand %p431_p0, %p119_p2  ;;  %s651_s24 = smov 8  }
   0xb   : > { %s430_s25 = sadd.s32 4294967294, %s647_s15   ;;  %s715_s26 = sadd.s32 1, %s647_s15  }
   0xc   : > { %p456_p4 = pneg %p704_p3  ;;  %s27_s27 = sadd.s32 1, %s643_s14 }
   0xd   : > { %s24_s28 = ssub.s32 %s647_s15, %s715_s26  ;;  %p34_p7 = scmp.ne.s32.totalorder %s643_s14, %s639_s13 }
   0xe   : > { %p457_p6 = pnand %p456_p4, %p41_p1  ;;  %p25_p8 = scmp.eq.s32.totalorder %s24_s28, 0 }
   0xf   : > { %p35_p9 = scmp.eq.s32.totalorder %s647_s15, 0  ;;  %p40_p10 = scmp.ne.s32.totalorder %s639_s13, %s635_s12 }
  0x10   : > { %459 = dma.hbm_to_vmem [thread:$0]  (!%p457_p6), %s131_s18, 512, %s133_s22, [#allocation6], %s650_s23, %s650_s23, %s651_s24  }
  0x11   : > { %p106_p11 = scmp.eq.s32.totalorder %s699_s19, 1  ;;  %p731_p12 = por %p41_p1, %p40_p10 }
  0x12   : > { %s727_s29 = scalar_select %p25_p8, %s643_s14, %s27_s27  }
  0x13   : > { %p735_p13 = por %p106_p11, %p34_p7  ;;  %p112_p0 = scmp.eq.s32.totalorder %s430_s25, 1 }
  0x14   : > { %p36_p2 = por %p35_p9, %p34_p7  ;;  %s149_s5 = sand.u32 1, %s643_s14  }
  0x15   : > { %p740_p4 = por %p112_p0, %p40_p10  ;;  %p469_p6 = scmp.lt.s32.totalorder %s647_s15, 2 }
  0x16   : > { %s434_s7 = sshll.u32 %s149_s5, 3  ;;  %s435_s8 = sshll.u32 %s647_s15, 3 }
  0x17   : > { %s157_s11 = scalar_lea.hbm %s827_s0, %s435_s8  ;;  %s153_s17 = scalar_lea.vmem [#allocation2], %s434_s7 }
  0x18   : > { %s159_s16 = sshll.u32 %s157_s11, 4  ;;  %s161_s18 = sshll.u32 %s153_s17, 4  ;;  %s160_s16 = int_to_ptr.hbm [resolvable:$true] %s159_s16  ;;  %s162_s18 = int_to_ptr.vmem [resolvable:$true] %s161_s18 }
  0x19   : > { %p749_p8 = pnand %p469_p6, %p36_p2  ;;  %s150_s22 = scalar_lea.sflag [#allocation3], %s149_s5 }
  0x1a   : > { %s547_s23 = sshra.s32 %s160_s16, 4  ;;  %s554_s28 = scalar_lea.hbm %s827_s0, 16  ;;  %s548_s23 = int_to_ptr.hbm [resolvable:$true] %s547_s23 }
  0x1b   : > { %s549_s24 = scalar_lea.hbm %s548_s23, 8  ;;  %p551_p9 = pneg %p749_p8 }
  0x1c   : > { %p550_p7 = scmp.ne.s32.totalorder %s548_s23, %s549_s24  ;;  %p555_p0 = scmp.lt.s32.totalorder %s548_s23, %s827_s0 }
  0x1d   : > { %p556_p2 = scmp.lt.s32.totalorder %s554_s28, %s549_s24 }
  0x1e   : > { %p552_p10 = pnand %p551_p9, %p550_p7 }
  0x1f   : > { %p557_p6 = por %p556_p2, %p555_p0 }
  0x20   : > { %p553_p11 = pneg %p552_p10 }
  0x22   : > { %p558_p5 = pnand %p557_p6, %p553_p11 }
  0x24   : > { %561 = shalt.err (!%p558_p5)
}
  0x25   : > { %463 = dma.hbm_to_vmem [thread:$0]  (!%p749_p8), %s160_s16, 128, %s162_s18, %s150_s22  }
  0x26   : > { %170 = sbr.rel (%p704_p3) target bundleno = 829 (0x33d), region = 32  ;;  %s766_s5 = sand.u32 (!%p704_p3), 1, %s639_s13  }
  0x27   : > { %s437_s9 = sshll.u32 (!%p704_p3), %s766_s5, 3  ;;  %s173_s10 = scalar_lea.sflag (!%p704_p3), [#allocation3], %s766_s5 }
  0x28   : > { %s176_s11 = scalar_lea.vmem (!%p704_p3), [#allocation2], %s437_s9 }
  0x2b   : > { %622 = dma.done.wait (%p731_p12), %s173_s10, 128  }
  0x2c   : > { %624 = vsyncadd (%p731_p12), %s173_s10, 4294967168 }
  0x2d   : > { %626 = dma.done.wait (%p41_p1), [#allocation6], 512  }
  0x2e   : > { %628 = vsyncadd (%p41_p1), [#allocation6], 4294966784  ;;  %v209_v0 = vld [vmem:[#allocation5 + $0x18] sm:$0xff]  ;;  %v208_v1 = vld [vmem:[#allocation5 + $0x10] sm:$0xff]  ;;  %vm214_vm0 = vcmask 261120   ;;  %vm238_vm1 = vcmask 130048   ;;  %v270_v14 = vlaneseq }
  0x2f   : > { %230 = vmatpush.msra.mxu0 %v209_v0  ;;  %v207_v2 = vld [vmem:[#allocation5 + $0x8] sm:$0xff]  ;;  %v206_v3 = vld [vmem:[#allocation5] sm:$0xff]  ;;  %v780_v4 = vld [vmem:[%s176_s11] sm:$0xff]  ;;  %s652_s16 = smov 112   ;;  %v653_v8 = vmov 4.0   ;;  %vm276_vm4 = vcmask 64512  }
  0x30   : > { %v510_v5 = vld [vmem:[%s829_s2] ss:$0 sm:$0xff]  ;;  %511 = vrcp.f32 %v653_v8  ;;  %v271_v16 = vshrl.u32 %v270_v14, 7  ;;  %v273_v17 = vand.u32 127, %v270_v14  ;;  %s654_s17 = smov 32   ;;  %s445_s18 = sshll.u32 %s699_s19, 3 }
  0x31   : > { %231 = vmatpush.msra.mxu0 %v208_v1  ;;  %s345_s23 = scalar_lea.hbm %s830_s3, %s445_s18  ;;  %s204_s24 = scalar_lea.vmem [#allocation7], %s437_s9  ;;  %vm332_vm9 = vcmask 392192  }
  0x32   : > { %vm274_vm3 = vcmp.ge.s32.totalorder %v271_v16, %v273_v17  ;;  %s347_s25 = sshll.u32 %s204_s24, 4  ;;  %s349_s27 = sshll.u32 %s345_s23, 4  ;;  %s348_s25 = int_to_ptr.vmem [resolvable:$true] %s347_s25  ;;  %s350_s27 = int_to_ptr.hbm [resolvable:$true] %s349_s27 }
  0x33   : > { %232 = vmatpush.msra.mxu0 %v207_v2  ;;  %s335_s28 = scalar_lea.sflag [#allocation4], %s766_s5  ;;  %s591_s7 = sshra.s32 %s350_s27, 4  ;;  %s592_s7 = int_to_ptr.hbm [resolvable:$true] %s591_s7 }
  0x34   : > { %s593_s19 = scalar_lea.hbm %s592_s7, 8  ;;  %s597_s10 = scalar_lea.hbm %s830_s3, 16 }
  0x35   : > { %233 = vmatpush.msra.mxu0 %v206_v3  ;;  %p594_p1 = scmp.ne.s32.totalorder %s592_s7, %s593_s19  ;;  %p598_p12 = scmp.lt.s32.totalorder %s592_s7, %s830_s3 }
  0x36   : > { %440 = vmatmul.msk.f32.vlgmr.msra.gmra.mxu0 %vm214_vm0, %v780_v4  ;;  %v512_v9 = vpop.eup %511  ;;  %p599_p8 = scmp.lt.s32.totalorder %s597_s10, %s593_s19 }
  0x37   : > { %v263_v10 = vmul.f32 4.0, %v512_v9  ;;  %vm267_vm2 = vweird.f32 %v512_v9  ;;  %p595_p3 = pnand %p594_p1, %p735_p13 }
  0x38   : > { %p600_p7 = por %p599_p8, %p598_p12 }
  0x39   : > { %v264_v12 = vsub.f32 1.0, %v263_v10  ;;  %p596_p5 = pneg %p595_p3 }
  0x3b   : > { %v265_v13 = vmul.f32 %v512_v9, %v264_v12  ;;  %p601_p9 = pnand %p600_p7, %p596_p5 }
  0x3d   : > { %v266_v15 = vadd.f32 %v512_v9, %v265_v13 }
  0x3f   : > { %v268_v18 = vsel %vm267_vm2, %v512_v9, %v266_v15 }
  0xb3   : > { %v235_v6 = vpop.f32.mrf.mxu0 }
  0xb4   : > { %v236_v7 = vadd.f32 %v510_v5, %v235_v6 }
  0xb6   : > { %301 = vrot.lane.b32.xlu1 %v236_v7, %s652_s16  ;;  %441 = vmatpush.xpose.msk.msra.mxu1 %vm238_vm1, %v236_v7 }
  0xb9   : > { %442 = vmatmul.msk.f32.vlgmr.msra.gmra.mxu1 %vm238_vm1, %v236_v7 }
 0x128   : > { %v302_v11 = vpop.permute.xlu1 %301 }
 0x129   : > { %322 = vmatpush.msra.mxu2 %v302_v11 }
 0x136   : > { %v259_v19 = vpop.f32.mrf.mxu1 }
 0x137   : > { %v269_v20 = vmul.f32 %v268_v18, %v259_v19 }
 0x139   : > { %v275_v21 = vsel %vm274_vm3, %v269_v20, -100.0 }
 0x13a   : > { %v277_v22 = vsel %vm276_vm4, %v275_v21, -inf }
 0x13b   : > { %278 = vmax.xlane.f32.xlu0 %v277_v22 }
 0x1ae   : > { %v279_v23 = vpop.xlane.xlu0 %278 }
 0x1af   : > { %v280_v24 = vsub.f32 %v275_v21, %v279_v23 }
 0x1b1   : > { %v281_v25 = vmul.f32 1.442695, %v280_v24 }
 0x1b3   : > { %513 = vpow2.f32 %v281_v25 }
 0x1b9   : > { %v514_v26 = vpop.eup %513 }
 0x1ba   : > { %v283_v27 = vsel %vm276_vm4, %v514_v26, 0.0 }
 0x1bb   : > { %284 = vadd.xlane.f32.xlu0 %v283_v27 }
 0x22e   : > { %v285_v28 = vpop.xlane.xlu0 %284 }
 0x22f   : > { %515 = vrcp.f32 %v285_v28  ;;  %v297_v32 = vand.u32 2147483648, %v285_v28  ;;  %v295_v34 = vand.u32 2147483647, %v285_v28  ;;  %vm291_vm6 = vweird.f32 %v285_v28 }
 0x231   : > { %v298_v36 = vor.u32 1.1754944e-38, %v297_v32  ;;  %vm296_vm8 = vcmp.eq.f32.partialorder %v295_v34, 8.507059e+37 }
 0x235   : > { %v516_v29 = vpop.eup %515 }
 0x236   : > { %v287_v30 = vmul.f32 %v516_v29, %v285_v28  ;;  %vm292_vm5 = vweird.f32 %v516_v29 }
 0x237   : > { %vm293_vm7 = vmor %vm291_vm6, %vm292_vm5 }
 0x238   : > { %v288_v31 = vsub.f32 1.0, %v287_v30 }
 0x23a   : > { %v289_v33 = vmul.f32 %v516_v29, %v288_v31 }
 0x23c   : > { %v290_v35 = vadd.f32 %v516_v29, %v289_v33 }
 0x23e   : > { %v294_v37 = vsel %vm293_vm7, %v516_v29, %v290_v35 }
 0x23f   : > { %v299_v38 = vsel %vm296_vm8, %v298_v36, %v294_v37 }
 0x240   : > { %v300_v39 = vmul.f32 %v514_v26, %v299_v38 }
 0x242   : > { %443 = vmatmul.msk.f32.vlgmr.msra.gmra.mxu2 %vm276_vm4, %v300_v39 }
 0x2c5   : > { %v324_v40 = vpop.f32.mrf.mxu2 }
 0x2c6   : > { %328 = vrot.lane.b32.xlu1 %v324_v40, %s654_s17 }
 0x338   : > { %v329_v41 = vpop.permute.xlu1 %328 }
 0x339   : > { %v331_v42 = vsel %vm214_vm0, %v780_v4, %v329_v41 }
 0x33a   : > { %333 = vst.msk [vmem:[%s204_s24] sm:$0xff] %vm332_vm9, %v331_v42 }
 0x33b   : > { %604 = shalt.err (!%p601_p9)
}
 0x33c   : > { %454 = dma.vmem_to_hbm [thread:$0]  (%p735_p13), %s348_s25, 128, %s350_s27, %s335_s28  }
 0x33d PF: > { %s361_s5 = sand.u32 1, %s635_s12   ;;  %p836_p10 = scmp.ge.s32.totalorder %s647_s15, 2 }
 0x33e   : > { %s362_s30 = scalar_lea.sflag [#allocation4], %s361_s5 }
 0x33f   : > { %p465_p11 = pnand %p836_p10, %p740_p4 }
 0x341   : > { %p466_p0 = pneg %p465_p11 }
 0x343   : > { %630 = dma.done.wait (%p466_p0), %s362_s30, 128  }
 0x344   : > { %632 = vsyncadd (%p466_p0), %s362_s30, 4294967168  ;;  %p17_p2 = scmp.ge.s32.totalorder %s715_s26, 4   ;;  %s837_s12 = smov %s639_s13 }
 0x345   : > { %s838_s13 = smov %s643_s14  ;;  %s839_s14 = smov %s727_s29 }
 0x346   : > { %s840_s15 = smov %s715_s26  ;;  %19 = sbr.rel (!%p17_p2) target bundleno = 6 (0x6), region = 81 }
 0x34b   :  { %368 = vsyncpa [#allocation3], 1 }
 0x34c   :  { %370 = vsyncpa [#allocation3 + $0x1], 1 }
 0x34d   :  { %371 = vsyncpa [#allocation6], 1 }
 0x34e   :  { %372 = vsyncpa [#allocation4], 1 }
 0x34f   :  { %374 = vsyncpa [#allocation4 + $0x1], 1 }

</bundles_post_ra>
